<compile_context>
chip_gen: v5e
topology: v5e:2x2
jax: 0.10.0
libtpu: 0.0.40
codegen_flags: <defaults>
</compile_context>

<pallas_src>
import numpy as np
import jax
import jax.numpy as jnp
from jax.experimental import pallas as pl
from jax.experimental.pallas import tpu as pltpu

BN_EPS = 1e-5
# TODO(synk): pre-0.4 PyTorch F.upsample behaved like align_corners=True; current
# default is align_corners=False. Flip this constant if legacy parity is required.
ALIGN_CORNERS = False


# ----------------------------------------------------------------------------
# Separable pooling / upsampling operators (deterministic, built on host).
# ----------------------------------------------------------------------------
def adaptive_pool_matrix(in_size: int, out_size: int) -> np.ndarray:
    """P[i, h] s.t. pooled[i] = sum_h P[i, h] * x[h]  (AdaptiveAvgPool semantics)."""
    P = np.zeros((out_size, in_size), np.float32)
    for i in range(out_size):
        start = (i * in_size) // out_size
        end = ((i + 1) * in_size + out_size - 1) // out_size  # ceil
        P[i, start:end] = 1.0 / float(end - start)
    return P


def bilinear_matrix(out_size: int, in_size: int, align_corners: bool = False) -> np.ndarray:
    """U[o, i] s.t. up[o] = sum_i U[o, i] * x[i]  (1-D bilinear interpolation)."""
    U = np.zeros((out_size, in_size), np.float32)
    for o in range(out_size):
        if align_corners:
            src = 0.0 if out_size == 1 else o * (in_size - 1) / (out_size - 1)
        else:
            scale = in_size / out_size
            src = max((o + 0.5) * scale - 0.5, 0.0)
        i0 = min(int(np.floor(src)), in_size - 1)
        i1 = min(i0 + 1, in_size - 1)
        frac = src - i0
        U[o, i0] += 1.0 - frac
        U[o, i1] += frac
    return U


def _pick_c_tile(C: int, target: int = 512) -> int:
    """Largest channel tile <= target that divides C (multiple of 128 when tiling)."""
    if C <= target:
        return C
    for t in range(target, 0, -128):
        if C % t == 0:
            return t
    return C  # no 128-multiple divisor: fall back to a single (untiled) pass


# ----------------------------------------------------------------------------
# Fused Pallas kernel: all pyramid levels, one batch element x one C-tile per step.
# Grid = (N, C // c_tile); batch axis "parallel", channel axis "arbitrary" (reduction).
# ----------------------------------------------------------------------------
def _make_ppm_kernel(level_meta, c_base, d, c_tile, kc_static, compute_dtype):
    # level_meta: tuple of (column offset into the concatenated SS axis, s*s) per level
    def kernel(x_ref, mt_ref, wf_ref, b_ref, ut_ref, o_ref, acc_ref):
        # x_ref : (1, c_tile, HW)  input channel tile (native dtype)
        # mt_ref: (HW, SST)        concatenated pooling operators (bf16)
        # wf_ref: (L, D, c_tile)   BN-folded 1x1 conv weights, this C tile (bf16)
        # b_ref : (D, SST)         BN-folded bias, broadcast per level column block (f32)
        # ut_ref: (SST, HW)        concatenated bilinear upsample operators (bf16)
        # o_ref : (1, C + L*D, HW) full output slab for this batch element
        # acc_ref: (D, SST) f32    conv accumulator across C tiles
        k = pl.program_id(1)
        kc = pl.num_programs(1)

        # -- passthrough: copy this channel tile of x into the first C output rows --
        x_tile = x_ref[0]                                             # (c_tile, HW)
        if kc_static == 1:
            o_ref[0, 0:c_tile, :] = x_tile.astype(o_ref.dtype)
        else:
            row = pl.multiple_of(k * c_tile, c_tile)
            o_ref[0, pl.ds(row, c_tile), :] = x_tile.astype(o_ref.dtype)

        # -- init accumulator with the folded-BN bias on the first channel tile --
        @pl.when(k == 0)
        def _():
            acc_ref[...] = b_ref[...]

        # -- matmul 1: adaptive average pooling for ALL levels at once --
        xb = x_tile.astype(compute_dtype)                             # bf16 for MXU
        pooled = jnp.dot(xb, mt_ref[...],
                         preferred_element_type=jnp.float32)          # (c_tile, SST) f32

        # -- matmul 2: per-level 1x1 conv (BN scale folded), partial sum over this tile --
        contribs = []
        for lvl, (off, ss) in enumerate(level_meta):
            p_l = pooled[:, off:off + ss].astype(compute_dtype)       # (c_tile, ss)
            contribs.append(jnp.dot(wf_ref[lvl], p_l,
                                    preferred_element_type=jnp.float32))  # (D, ss)
        acc_ref[...] = acc_ref[...] + jnp.concatenate(contribs, axis=1)    # (D, SST)

        # -- finalize: ReLU (f32), bilinear upsample, in-place write of branch channels --
        @pl.when(k == kc - 1)
        def _():
            acc = acc_ref[...]                                        # (D, SST) f32
            ut = ut_ref[...]                                          # (SST, HW) bf16
            for lvl, (off, ss) in enumerate(level_meta):
                y = jnp.maximum(acc[:, off:off + ss], 0.0).astype(compute_dtype)
                up = jnp.dot(y, ut[off:off + ss, :],
                             preferred_element_type=jnp.float32)      # (D, HW)
                o_ref[0, c_base + lvl * d: c_base + (lvl + 1) * d, :] = up.astype(o_ref.dtype)

    return kernel


# ----------------------------------------------------------------------------
# Module forward (single fused pallas_call).
# ----------------------------------------------------------------------------
def pyramid_pooling_forward(x, params, setting, *, compute_dtype=jnp.bfloat16,
                            c_tile=None, align_corners=ALIGN_CORNERS):
    """x: (N, C, H, W).  Returns (N, C + len(setting)*D, H, W), dtype of x."""
    N, C, H, W = x.shape
    HW = H * W
    L = len(setting)
    D = params[0][0].shape[0]

    ss_list = [s * s for s in setting]
    offs = [0]
    for ss in ss_list:
        offs.append(offs[-1] + ss)
    SST = offs[-1]
    level_meta = tuple((offs[i], ss_list[i]) for i in range(L))

    # Concatenated pooling / upsampling operators (Kronecker of the separable 1-D ops).
    mt_np = np.concatenate(
        [np.kron(adaptive_pool_matrix(H, s), adaptive_pool_matrix(W, s)).T for s in setting],
        axis=1)                                                   # (HW, SST)
    ut_np = np.concatenate(
        [np.kron(bilinear_matrix(H, s, align_corners), bilinear_matrix(W, s, align_corners)).T
         for s in setting], axis=0)                               # (SST, HW)
    mt_all = jnp.asarray(mt_np).astype(compute_dtype)
    ut_all = jnp.asarray(ut_np).astype(compute_dtype)

    # Fold eval-mode BatchNorm into the 1x1 conv; bias becomes the accumulator init slab.
    # TODO(synk): training-mode BatchNorm (batch statistics of the pooled map) is not reproduced.
    wf_list, b_cols = [], []
    for lvl, s in enumerate(setting):
        w_conv, gamma, beta, r_mean, r_var = params[lvl]
        inv = gamma / jnp.sqrt(r_var + BN_EPS)                    # (D,)
        wf_list.append((w_conv * inv[:, None]).astype(compute_dtype))   # (D, C)
        b_lvl = (beta - r_mean * inv).astype(jnp.float32)               # (D,)
        b_cols.append(jnp.broadcast_to(b_lvl[:, None], (D, s * s)))
    wf_all = jnp.stack(wf_list, axis=0)                           # (L, D, C) bf16
    b_slab = jnp.concatenate(b_cols, axis=1)                      # (D, SST) f32

    if c_tile is None:
        c_tile = _pick_c_tile(C)
    assert C % c_tile == 0
    kc = C // c_tile
    c_total = C + L * D

    x3 = x.reshape(N, C, HW)
    kernel = _make_ppm_kernel(level_meta, C, D, c_tile, kc, compute_dtype)

    out3 = pl.pallas_call(
        kernel,
        out_shape=jax.ShapeDtypeStruct((N, c_total, HW), x.dtype),
        grid_spec=pltpu.PrefetchScalarGridSpec(
            num_scalar_prefetch=0,
            grid=(N, kc),
            in_specs=[
                pl.BlockSpec((1, c_tile, HW), lambda n, k: (n, k, 0)),   # streamed x tile
                pl.BlockSpec((HW, SST), lambda n, k: (0, 0)),            # pooling operator
                pl.BlockSpec((L, D, c_tile), lambda n, k: (0, 0, k)),    # conv weights tile
                pl.BlockSpec((D, SST), lambda n, k: (0, 0)),             # folded bias slab
                pl.BlockSpec((SST, HW), lambda n, k: (0, 0)),            # upsample operator
            ],
            out_specs=pl.BlockSpec((1, c_total, HW), lambda n, k: (n, 0, 0)),
            scratch_shapes=[pltpu.VMEM((D, SST), jnp.float32)],
        ),
        compiler_params=pltpu.CompilerParams(
            dimension_semantics=("parallel", "arbitrary"),   # batch across TCs, C is a reduction
            vmem_limit_bytes=64 * 1024 * 1024,
        ),
    )(x3, mt_all, wf_all, b_slab, ut_all)

    return out3.reshape(N, c_total, H, W)


# ----------------------------------------------------------------------------
# Pure-JAX reference (optionally emulating the kernel's bf16 compute) for checking.
# ----------------------------------------------------------------------------
def pyramid_pooling_reference(x, params, setting, compute_dtype=None,
                              align_corners=ALIGN_CORNERS):
    N, C, H, W = x.shape
    HW = H * W
    x3 = x.reshape(N, C, HW)

    def cast(a):
        return a.astype(compute_dtype) if compute_dtype is not None else a

    outs = [x]
    for lvl, s in enumerate(setting):
        mt = jnp.asarray(np.kron(adaptive_pool_matrix(H, s), adaptive_pool_matrix(W, s)).T)
        ut = jnp.asarray(np.kron(bilinear_matrix(H, s, align_corners),
                                 bilinear_matrix(W, s, align_corners)).T)
        w_conv, gamma, beta, r_mean, r_var = params[lvl]
        inv = gamma / jnp.sqrt(r_var + BN_EPS)
        wf = w_conv * inv[:, None]
        b = beta - r_mean * inv
        pooled = jnp.einsum("nch,hs->ncs", cast(x3), cast(mt),
                            preferred_element_type=jnp.float32)
        y = jnp.einsum("dc,ncs->nds", cast(wf), cast(pooled),
                       preferred_element_type=jnp.float32)
        y = jnp.maximum(y + b[None, :, None], 0.0)
        up = jnp.einsum("nds,sp->ndp", cast(y), cast(ut),
                        preferred_element_type=jnp.float32)
        outs.append(up.astype(x.dtype).reshape(N, -1, H, W))
    return jnp.concatenate(outs, axis=1)


def init_params(key, in_dim, reduction_dim, setting):
    params = []
    for _ in setting:
        key, k_w, k_g, k_b, k_m, k_v = jax.random.split(key, 6)
        w_conv = jax.random.normal(k_w, (reduction_dim, in_dim), jnp.float32) * 0.5
        gamma = jax.random.uniform(k_g, (reduction_dim,), jnp.float32, 0.5, 1.5)
        beta = jax.random.normal(k_b, (reduction_dim,), jnp.float32) * 0.1
        r_mean = jax.random.normal(k_m, (reduction_dim,), jnp.float32) * 0.1
        r_var = jax.random.uniform(k_v, (reduction_dim,), jnp.float32, 0.5, 1.5)
        params.append((w_conv, gamma, beta, r_mean, r_var))
    return params


if __name__ == "__main__":
    N, C_in, H, W = 2, 4, 16, 16
    reduction_dim = 2
    setting = (1, 2, 3, 6)

    key = jax.random.PRNGKey(0)
    key, k_x = jax.random.split(key)
    x = jax.random.normal(k_x, (N, C_in, H, W), jnp.float32)
    params = init_params(key, C_in, reduction_dim, setting)

    out = pyramid_pooling_forward(x, params, setting)
    out = jax.block_until_ready(out)

    C_total = C_in + len(setting) * reduction_dim
    assert out.shape == (N, C_total, H, W), out.shape

    # Passthrough channels are an exact copy of x (written in-kernel, no wrapper concat).
    assert bool(jnp.array_equal(out[:, :C_in], x)), "passthrough mismatch"

    # Tight check vs. a reference that emulates the kernel's bf16 compute path.
    ref_bf = jax.block_until_ready(
        pyramid_pooling_reference(x, params, setting, compute_dtype=jnp.bfloat16))
    err_bf = float(jnp.max(jnp.abs(out - ref_bf)))
    assert jnp.allclose(out, ref_bf, atol=1e-3, rtol=1e-3), err_bf

    # Looser check vs. the full-f32 module semantics (bf16 MXU rounding tolerance).
    ref_32 = jax.block_until_ready(pyramid_pooling_reference(x, params, setting))
    err_32 = float(jnp.max(jnp.abs(out - ref_32)))
    assert jnp.allclose(out, ref_32, atol=5e-2, rtol=5e-2), err_32

    print("KERNEL_OK")
</pallas_src>

<mosaic_0001>
module attributes {stable_mosaic.version = 11 : i64} {
  func.func @kernel(%arg0: i32, %arg1: i32, %arg2: memref<1x4x256xf32, #tpu.memory_space<vmem>>, %arg3: memref<256x50xbf16, #tpu.memory_space<vmem>>, %arg4: memref<4x2x4xbf16, #tpu.memory_space<vmem>>, %arg5: memref<2x50xf32, #tpu.memory_space<vmem>>, %arg6: memref<50x256xbf16, #tpu.memory_space<vmem>>, %arg7: memref<1x12x256xf32, #tpu.memory_space<vmem>>, %arg8: memref<2x50xf32, #tpu.memory_space<vmem>>) attributes {dimension_semantics = [#tpu.dimension_semantics<parallel>, #tpu.dimension_semantics<arbitrary>], iteration_bounds = array<i64: 2, 1>, scalar_prefetch = 0 : i64, scratch_operands = 1 : i64, tpu.core_type = #tpu.core_type<tc>, window_params = [{transform_indices = @transform_0, window_bounds = array<i64: 1, 4, 256>}, {pipeline_mode = #tpu.pipeline_mode<synchronous>, transform_indices = @transform_1, window_bounds = array<i64: 256, 50>}, {transform_indices = @transform_2, window_bounds = array<i64: 4, 2, 4>}, {pipeline_mode = #tpu.pipeline_mode<synchronous>, transform_indices = @transform_3, window_bounds = array<i64: 2, 50>}, {pipeline_mode = #tpu.pipeline_mode<synchronous>, transform_indices = @transform_4, window_bounds = array<i64: 50, 256>}, {transform_indices = @transform_5, window_bounds = array<i64: 1, 12, 256>}]} {
    %c0 = arith.constant 0 : index
    %c0_0 = arith.constant 0 : index
    %c0_1 = arith.constant 0 : index
    %0 = vector.load %arg2[%c0, %c0_0, %c0_1] : memref<1x4x256xf32, #tpu.memory_space<vmem>>, vector<1x4x256xf32>
    %1 = vector.shape_cast %0 : vector<1x4x256xf32> to vector<4x256xf32>
    %c0_2 = arith.constant 0 : index
    %c0_3 = arith.constant 0 : index
    %c0_4 = arith.constant 0 : index
    %2 = vector.load %arg7[%c0_2, %c0_3, %c0_4] : memref<1x12x256xf32, #tpu.memory_space<vmem>>, vector<1x4x256xf32>
    %3 = vector.shape_cast %2 : vector<1x4x256xf32> to vector<4x256xf32>
    %4 = vector.shape_cast %1 : vector<4x256xf32> to vector<1x4x256xf32>
    tpu.vector_store %arg7[%c0_2, %c0_3, %c0_4], %4 {strides = array<i32>} : memref<1x12x256xf32, #tpu.memory_space<vmem>>, vector<1x4x256xf32>,
    %c0_i32 = arith.constant 0 : i32
    %5 = arith.cmpi eq, %arg1, %c0_i32 : i32
    %6 = arith.extui %5 : i1 to i32
    %c0_i32_5 = arith.constant 0 : i32
    %7 = arith.cmpi ne, %6, %c0_i32_5 : i32
    scf.if %7 {
      %c0_27 = arith.constant 0 : index
      %c0_28 = arith.constant 0 : index
      %38 = vector.load %arg5[%c0_27, %c0_28] : memref<2x50xf32, #tpu.memory_space<vmem>>, vector<2x50xf32>
      %c0_29 = arith.constant 0 : index
      %c0_30 = arith.constant 0 : index
      %39 = vector.load %arg8[%c0_29, %c0_30] : memref<2x50xf32, #tpu.memory_space<vmem>>, vector<2x50xf32>
      tpu.vector_store %arg8[%c0_29, %c0_30], %38 {strides = array<i32>} : memref<2x50xf32, #tpu.memory_space<vmem>>, vector<2x50xf32>,
    } else {
    }
    %8 = arith.truncf %1 : vector<4x256xf32> to vector<4x256xbf16>
    %c0_6 = arith.constant 0 : index
    %c0_7 = arith.constant 0 : index
    %9 = vector.load %arg3[%c0_6, %c0_7] : memref<256x50xbf16, #tpu.memory_space<vmem>>, vector<256x50xbf16>
    %cst = arith.constant dense<0.000000e+00> : vector<4x50xf32>
    %10 = tpu.matmul %8, %9, %cst {dimension_numbers = #tpu.dot_dimension_numbers<[1], [0], [0], [1], [0, 0, 1, 1], [], []>} : vector<4x256xbf16>, vector<256x50xbf16>, vector<4x50xf32> -> vector<4x50xf32>
    %11 = vector.extract_strided_slice %10 {offsets = [0, 0], sizes = [4, 1], strides = [1, 1]} : vector<4x50xf32> to vector<4x1xf32>
    %12 = arith.truncf %11 : vector<4x1xf32> to vector<4x1xbf16>
    %c0_8 = arith.constant 0 : index
    %c0_9 = arith.constant 0 : index
    %c0_10 = arith.constant 0 : index
    %13 = vector.load %arg4[%c0_8, %c0_9, %c0_10] : memref<4x2x4xbf16, #tpu.memory_space<vmem>>, vector<1x2x4xbf16>
    %14 = vector.shape_cast %13 : vector<1x2x4xbf16> to vector<2x4xbf16>
    %cst_11 = arith.constant dense<0.000000e+00> : vector<2x1xf32>
    %15 = tpu.matmul %14, %12, %cst_11 {dimension_numbers = #tpu.dot_dimension_numbers<[1], [0], [0], [1], [0, 0, 1, 1], [], []>} : vector<2x4xbf16>, vector<4x1xbf16>, vector<2x1xf32> -> vector<2x1xf32>
    %16 = vector.extract_strided_slice %10 {offsets = [0, 1], sizes = [4, 4], strides = [1, 1]} : vector<4x50xf32> to vector<4x4xf32>
    %17 = arith.truncf %16 : vector<4x4xf32> to vector<4x4xbf16>
    %c1 = arith.constant 1 : index
    %c0_12 = arith.constant 0 : index
    %c0_13 = arith.constant 0 : index
    %18 = vector.load %arg4[%c1, %c0_12, %c0_13] : memref<4x2x4xbf16, #tpu.memory_space<vmem>>, vector<1x2x4xbf16>
    %19 = vector.shape_cast %18 : vector<1x2x4xbf16> to vector<2x4xbf16>
    %cst_14 = arith.constant dense<0.000000e+00> : vector<2x4xf32>
    %20 = tpu.matmul %19, %17, %cst_14 {dimension_numbers = #tpu.dot_dimension_numbers<[1], [0], [0], [1], [0, 0, 1, 1], [], []>} : vector<2x4xbf16>, vector<4x4xbf16>, vector<2x4xf32> -> vector<2x4xf32>
    %21 = vector.extract_strided_slice %10 {offsets = [0, 5], sizes = [4, 9], strides = [1, 1]} : vector<4x50xf32> to vector<4x9xf32>
    %22 = arith.truncf %21 : vector<4x9xf32> to vector<4x9xbf16>
    %c2 = arith.constant 2 : index
    %c0_15 = arith.constant 0 : index
    %c0_16 = arith.constant 0 : index
    %23 = vector.load %arg4[%c2, %c0_15, %c0_16] : memref<4x2x4xbf16, #tpu.memory_space<vmem>>, vector<1x2x4xbf16>
    %24 = vector.shape_cast %23 : vector<1x2x4xbf16> to vector<2x4xbf16>
    %cst_17 = arith.constant dense<0.000000e+00> : vector<2x9xf32>
    %25 = tpu.matmul %24, %22, %cst_17 {dimension_numbers = #tpu.dot_dimension_numbers<[1], [0], [0], [1], [0, 0, 1, 1], [], []>} : vector<2x4xbf16>, vector<4x9xbf16>, vector<2x9xf32> -> vector<2x9xf32>
    %26 = vector.extract_strided_slice %10 {offsets = [0, 14], sizes = [4, 36], strides = [1, 1]} : vector<4x50xf32> to vector<4x36xf32>
    %27 = arith.truncf %26 : vector<4x36xf32> to vector<4x36xbf16>
    %c3 = arith.constant 3 : index
    %c0_18 = arith.constant 0 : index
    %c0_19 = arith.constant 0 : index
    %28 = vector.load %arg4[%c3, %c0_18, %c0_19] : memref<4x2x4xbf16, #tpu.memory_space<vmem>>, vector<1x2x4xbf16>
    %29 = vector.shape_cast %28 : vector<1x2x4xbf16> to vector<2x4xbf16>
    %cst_20 = arith.constant dense<0.000000e+00> : vector<2x36xf32>
    %30 = tpu.matmul %29, %27, %cst_20 {dimension_numbers = #tpu.dot_dimension_numbers<[1], [0], [0], [1], [0, 0, 1, 1], [], []>} : vector<2x4xbf16>, vector<4x36xbf16>, vector<2x36xf32> -> vector<2x36xf32>
    %c0_21 = arith.constant 0 : index
    %c0_22 = arith.constant 0 : index
    %31 = vector.load %arg8[%c0_21, %c0_22] : memref<2x50xf32, #tpu.memory_space<vmem>>, vector<2x50xf32>
    %32 = tpu.concatenate %15, %20, %25, %30 in 1 : vector<2x1xf32>, vector<2x4xf32>, vector<2x9xf32>, vector<2x36xf32> -> vector<2x50xf32>
    %33 = arith.addf %31, %32 : vector<2x50xf32>
    %c0_23 = arith.constant 0 : index
    %c0_24 = arith.constant 0 : index
    %34 = vector.load %arg8[%c0_23, %c0_24] : memref<2x50xf32, #tpu.memory_space<vmem>>, vector<2x50xf32>
    tpu.vector_store %arg8[%c0_23, %c0_24], %33 {strides = array<i32>} : memref<2x50xf32, #tpu.memory_space<vmem>>, vector<2x50xf32>,
    %c0_i32_25 = arith.constant 0 : i32
    %35 = arith.cmpi eq, %arg1, %c0_i32_25 : i32
    %36 = arith.extui %35 : i1 to i32
    %c0_i32_26 = arith.constant 0 : i32
    %37 = arith.cmpi ne, %36, %c0_i32_26 : i32
    scf.if %37 {
      %c0_27 = arith.constant 0 : index
      %c0_28 = arith.constant 0 : index
      %38 = vector.load %arg8[%c0_27, %c0_28] : memref<2x50xf32, #tpu.memory_space<vmem>>, vector<2x50xf32>
      %c0_29 = arith.constant 0 : index
      %c0_30 = arith.constant 0 : index
      %39 = vector.load %arg6[%c0_29, %c0_30] : memref<50x256xbf16, #tpu.memory_space<vmem>>, vector<50x256xbf16>
      %40 = vector.extract_strided_slice %38 {offsets = [0, 0], sizes = [2, 1], strides = [1, 1]} : vector<2x50xf32> to vector<2x1xf32>
      %cst_31 = arith.constant 0.000000e+00 : f32
      %41 = vector.broadcast %cst_31 : f32 to vector<2x1xf32>
      %42 = arith.maximumf %40, %41 : vector<2x1xf32>
      %43 = arith.truncf %42 : vector<2x1xf32> to vector<2x1xbf16>
      %44 = vector.extract_strided_slice %39 {offsets = [0, 0], sizes = [1, 256], strides = [1, 1]} : vector<50x256xbf16> to vector<1x256xbf16>
      %cst_32 = arith.constant dense<0.000000e+00> : vector<2x256xf32>
      %45 = tpu.matmul %43, %44, %cst_32 {dimension_numbers = #tpu.dot_dimension_numbers<[1], [0], [0], [1], [0, 0, 1, 1], [], []>} : vector<2x1xbf16>, vector<1x256xbf16>, vector<2x256xf32> -> vector<2x256xf32>
      %c0_33 = arith.constant 0 : index
      %c4 = arith.constant 4 : index
      %c0_34 = arith.constant 0 : index
      %46 = vector.load %arg7[%c0_33, %c4, %c0_34] : memref<1x12x256xf32, #tpu.memory_space<vmem>>, vector<1x2x256xf32>
      %47 = vector.shape_cast %46 : vector<1x2x256xf32> to vector<2x256xf32>
      %48 = vector.shape_cast %45 : vector<2x256xf32> to vector<1x2x256xf32>
      tpu.vector_store %arg7[%c0_33, %c4, %c0_34], %48 {strides = array<i32>} : memref<1x12x256xf32, #tpu.memory_space<vmem>>, vector<1x2x256xf32>,
      %49 = vector.extract_strided_slice %38 {offsets = [0, 1], sizes = [2, 4], strides = [1, 1]} : vector<2x50xf32> to vector<2x4xf32>
      %cst_35 = arith.constant 0.000000e+00 : f32
      %50 = vector.broadcast %cst_35 : f32 to vector<2x4xf32>
      %51 = arith.maximumf %49, %50 : vector<2x4xf32>
      %52 = arith.truncf %51 : vector<2x4xf32> to vector<2x4xbf16>
      %53 = vector.extract_strided_slice %39 {offsets = [1, 0], sizes = [4, 256], strides = [1, 1]} : vector<50x256xbf16> to vector<4x256xbf16>
      %cst_36 = arith.constant dense<0.000000e+00> : vector<2x256xf32>
      %54 = tpu.matmul %52, %53, %cst_36 {dimension_numbers = #tpu.dot_dimension_numbers<[1], [0], [0], [1], [0, 0, 1, 1], [], []>} : vector<2x4xbf16>, vector<4x256xbf16>, vector<2x256xf32> -> vector<2x256xf32>
      %c0_37 = arith.constant 0 : index
      %c6 = arith.constant 6 : index
      %c0_38 = arith.constant 0 : index
      %55 = vector.load %arg7[%c0_37, %c6, %c0_38] : memref<1x12x256xf32, #tpu.memory_space<vmem>>, vector<1x2x256xf32>
      %56 = vector.shape_cast %55 : vector<1x2x256xf32> to vector<2x256xf32>
      %57 = vector.shape_cast %54 : vector<2x256xf32> to vector<1x2x256xf32>
      tpu.vector_store %arg7[%c0_37, %c6, %c0_38], %57 {strides = array<i32>} : memref<1x12x256xf32, #tpu.memory_space<vmem>>, vector<1x2x256xf32>,
      %58 = vector.extract_strided_slice %38 {offsets = [0, 5], sizes = [2, 9], strides = [1, 1]} : vector<2x50xf32> to vector<2x9xf32>
      %cst_39 = arith.constant 0.000000e+00 : f32
      %59 = vector.broadcast %cst_39 : f32 to vector<2x9xf32>
      %60 = arith.maximumf %58, %59 : vector<2x9xf32>
      %61 = arith.truncf %60 : vector<2x9xf32> to vector<2x9xbf16>
      %62 = vector.extract_strided_slice %39 {offsets = [5, 0], sizes = [9, 256], strides = [1, 1]} : vector<50x256xbf16> to vector<9x256xbf16>
      %cst_40 = arith.constant dense<0.000000e+00> : vector<2x256xf32>
      %63 = tpu.matmul %61, %62, %cst_40 {dimension_numbers = #tpu.dot_dimension_numbers<[1], [0], [0], [1], [0, 0, 1, 1], [], []>} : vector<2x9xbf16>, vector<9x256xbf16>, vector<2x256xf32> -> vector<2x256xf32>
      %c0_41 = arith.constant 0 : index
      %c8 = arith.constant 8 : index
      %c0_42 = arith.constant 0 : index
      %64 = vector.load %arg7[%c0_41, %c8, %c0_42] : memref<1x12x256xf32, #tpu.memory_space<vmem>>, vector<1x2x256xf32>
      %65 = vector.shape_cast %64 : vector<1x2x256xf32> to vector<2x256xf32>
      %66 = vector.shape_cast %63 : vector<2x256xf32> to vector<1x2x256xf32>
      tpu.vector_store %arg7[%c0_41, %c8, %c0_42], %66 {strides = array<i32>} : memref<1x12x256xf32, #tpu.memory_space<vmem>>, vector<1x2x256xf32>,
      %67 = vector.extract_strided_slice %38 {offsets = [0, 14], sizes = [2, 36], strides = [1, 1]} : vector<2x50xf32> to vector<2x36xf32>
      %cst_43 = arith.constant 0.000000e+00 : f32
      %68 = vector.broadcast %cst_43 : f32 to vector<2x36xf32>
      %69 = arith.maximumf %67, %68 : vector<2x36xf32>
      %70 = arith.truncf %69 : vector<2x36xf32> to vector<2x36xbf16>
      %71 = vector.extract_strided_slice %39 {offsets = [14, 0], sizes = [36, 256], strides = [1, 1]} : vector<50x256xbf16> to vector<36x256xbf16>
      %cst_44 = arith.constant dense<0.000000e+00> : vector<2x256xf32>
      %72 = tpu.matmul %70, %71, %cst_44 {dimension_numbers = #tpu.dot_dimension_numbers<[1], [0], [0], [1], [0, 0, 1, 1], [], []>} : vector<2x36xbf16>, vector<36x256xbf16>, vector<2x256xf32> -> vector<2x256xf32>
      %c0_45 = arith.constant 0 : index
      %c10 = arith.constant 10 : index
      %c0_46 = arith.constant 0 : index
      %73 = vector.load %arg7[%c0_45, %c10, %c0_46] : memref<1x12x256xf32, #tpu.memory_space<vmem>>, vector<1x2x256xf32>
      %74 = vector.shape_cast %73 : vector<1x2x256xf32> to vector<2x256xf32>
      %75 = vector.shape_cast %72 : vector<2x256xf32> to vector<1x2x256xf32>
      tpu.vector_store %arg7[%c0_45, %c10, %c0_46], %75 {strides = array<i32>} : memref<1x12x256xf32, #tpu.memory_space<vmem>>, vector<1x2x256xf32>,
    } else {
    }
    return
  }
  func.func @transform_0(%arg0: i32, %arg1: i32) -> (i32, i32, i32) {
    %c0_i32 = arith.constant 0 : i32
    %c0_i32_0 = arith.constant 0 : i32
    return %arg0, %arg1, %c0_i32 : i32, i32, i32
  }
  func.func @transform_1(%arg0: i32, %arg1: i32) -> (i32, i32) {
    %c0_i32 = arith.constant 0 : i32
    %c0_i32_0 = arith.constant 0 : i32
    %c0_i32_1 = arith.constant 0 : i32
    return %c0_i32, %c0_i32_0 : i32, i32
  }
  func.func @transform_2(%arg0: i32, %arg1: i32) -> (i32, i32, i32) {
    %c0_i32 = arith.constant 0 : i32
    %c0_i32_0 = arith.constant 0 : i32
    %c0_i32_1 = arith.constant 0 : i32
    return %c0_i32, %c0_i32_0, %arg1 : i32, i32, i32
  }
  func.func @transform_3(%arg0: i32, %arg1: i32) -> (i32, i32) {
    %c0_i32 = arith.constant 0 : i32
    %c0_i32_0 = arith.constant 0 : i32
    %c0_i32_1 = arith.constant 0 : i32
    return %c0_i32, %c0_i32_0 : i32, i32
  }
  func.func @transform_4(%arg0: i32, %arg1: i32) -> (i32, i32) {
    %c0_i32 = arith.constant 0 : i32
    %c0_i32_0 = arith.constant 0 : i32
    %c0_i32_1 = arith.constant 0 : i32
    return %c0_i32, %c0_i32_0 : i32, i32
  }
  func.func @transform_5(%arg0: i32, %arg1: i32) -> (i32, i32, i32) {
    %c0_i32 = arith.constant 0 : i32
    %c0_i32_0 = arith.constant 0 : i32
    %c0_i32_1 = arith.constant 0 : i32
    return %arg0, %c0_i32, %c0_i32_0 : i32, i32, i32
  }
}

</mosaic_0001>

<bundles_post_ra>
// kernel: tpu_custom_call.1
= control target key start
LH: loop header
LB: loop body
LE: loop exit
PB: predicated region body
PF: predicated region fallthrough
CT: control target
= control target key end

     0   :  { %s1135_s18 = smov 0   ;;  %s1137_s19 = smov 0   ;;  %s1316_s0 = inlined_call_operand.vmem [shape: f32[2,4,256], index: 0, kind: input, shape index: {}]   ;;  %s1317_s1 = inlined_call_operand.vmem [shape: bf16[256,50], index: 1, kind: input, shape index: {}]   ;;  %s1318_s2 = inlined_call_operand.vmem [shape: bf16[4,2,4], index: 2, kind: input, shape index: {}]   ;;  %s1319_s3 = inlined_call_operand.vmem [shape: f32[2,50], index: 3, kind: input, shape index: {}]   ;;  %s1320_s4 = inlined_call_operand.vmem [shape: bf16[50,256], index: 4, kind: input, shape index: {}]   ;;  %s1321_s5 = inlined_call_operand.vmem [shape: f32[2,12,256], index: 5, kind: output, shape index: {}]  }
   0x1   :  { %s1139_s20 = smov 0  }
   0x2 LB: > { %s27_s21 = sadd.s32 1, %s1091_s19  ;;  %p917_p0 = scmp.ge.s32.totalorder %s1095_s20, 1  ;;  %s1095_s20 = sphi %s1139_s20, %s15_s20   ;;  %s1091_s19 = sphi %s1137_s19, %s1323_s19   ;;  %s1087_s18 = sphi %s1135_s18, %s1322_s18  }
   0x3   : > { %p29_p1 = scmp.ge.s32.totalorder %s27_s21, 2  ;;  %p213_p2 = scmp.lt.s32.totalorder %s1095_s20, 3 }
   0x5   : > { %s1325_s21 = smov (%p29_p1, %s27_s21), 0  ;;  %p214_p3 = pnand %p917_p0, %p213_p2 }
   0x6   : > { %p248_p4 = scmp.lt.s32.totalorder (!%p214_p3), %s1087_s18, 1  ;;  %s1097_s12 = smov (!%p214_p3), 114  }
   0x7   : > { %217 = sbr.rel (%p214_p3) target bundleno = 824 (0x338), region = 40  ;;  %s1098_s13 = smov (!%p214_p3), 127  }
   0x8   : > { %s1099_s14 = smov (!%p214_p3), 123   ;;  %s1100_s27 = smov (!%p214_p3), 1  }
   0x9   : > { %s1101_s28 = smov (!%p214_p3), 5   ;;  %s1102_s29 = smov (!%p214_p3), 14  }
   0xc   : > { %v1028_v0 = vld [vmem:[%s1317_s1 + $0x38] sm:$0xff]  ;;  %v1027_v2 = vld [vmem:[%s1317_s1 + $0x30] sm:$0xff]  ;;  %s1327_s18 = smov (!%p248_p4, %s1087_s18), 1  ;;  %v1026_v4 = vld [vmem:[%s1317_s1 + $0x28] sm:$0xff]  ;;  %vm449_vm0 = vcmask 1041408   ;;  %vm445_vm1 = vcmask 31744  }
   0xd   : > { %v1036_v1 = vld [vmem:[%s1317_s1 + $0x78] sm:$0xff]  ;;  %417 = vmatpush.bf16.msra.mxu0 %v1028_v0  ;;  %v1035_v3 = vld [vmem:[%s1317_s1 + $0x70] sm:$0xff]  ;;  %s1019_s30 = sshll.u32 %s1327_s18, 3  ;;  %v1034_v5 = vld [vmem:[%s1317_s1 + $0x68] sm:$0xff]  ;;  %vm280_vm2 = vcmask 402432   ;;  %vm579_vm3 = vcmask 1040384  }
   0xe   : > { %430 = vmatpush.bf16.msra.mxu1 %v1036_v1  ;;  %s256_s8 = scalar_lea.vmem %s1316_s0, %s1019_s30  ;;  %v1025_v7 = vld [vmem:[%s1317_s1 + $0x20] sm:$0xff]  ;;  %v1024_v9 = vld [vmem:[%s1317_s1 + $0x18] sm:$0xff]  ;;  %v1023_v13 = vld [vmem:[%s1317_s1 + $0x10] sm:$0xff]  ;;  %v1103_v52 = vmov 0   ;;  %vm549_vm4 = vcmask 7168   ;;  %vm551_vm5 = vcmask 39936  }
   0xf   : > { %v266_v6 = vld [vmem:[%s256_s8] sm:$0xff]  ;;  %v1032_v10 = vld [vmem:[%s1317_s1 + $0x58] sm:$0xff]  ;;  %v1031_v14 = vld [vmem:[%s1317_s1 + $0x50] sm:$0xff]  ;;  %v581_v53 = vsel %vm579_vm3, 65535, %v1103_v52  ;;  %vm553_vm6 = vcmask 113664   ;;  %s1020_s9 = sshll.u32 %s1327_s18, 5 }
  0x10   : > { %268 = vst [vmem:[#allocation1] ss:$2 sm:$0xff] %v266_v6  ;;  %v1033_v8 = vld [vmem:[%s1317_s1 + $0x60] sm:$0xff]  ;;  %v1022_v15 = vld [vmem:[%s1317_s1 + $0x8] sm:$0xff]  ;;  %s1247_s15 = scalar_lea.vmem %s1321_s5, %s1020_s9  ;;  %vm707_vm7 = vcmask 1043456   ;;  %vm708_vm8 = vcmask 1044480  }
  0x11   : > { %418 = vmatpush.bf16.msra.mxu0 %v1027_v2  ;;  %v1030_v16 = vld [vmem:[%s1317_s1 + $0x48] sm:$0xff]  ;;  %v1021_v17 = vld [vmem:[%s1317_s1] sm:$0xff]  ;;  %vm703_vm9 = vcmask 72704   ;;  %vm783_vm10 = vcmask 293888  }
  0x12   : > { %431 = vmatpush.bf16.msra.mxu1 %v1035_v3  ;;  %v1029_v18 = vld [vmem:[%s1317_s1 + $0x40] sm:$0xff] }
  0x13   : > { %v444_v30 = vld [vmem:[%s1318_s2] sm:$0x1]  ;;  %v987_v35 = vld [vmem:[%s1318_s2 + $0x1] sm:$0x1]  ;;  %v989_v38 = vld [vmem:[%s1318_s2 + $0x2] sm:$0x1] }
  0x14   : > { %v991_v39 = vld [vmem:[%s1318_s2 + $0x3] sm:$0x1]  ;;  %v279_v48 = vld [vmem:[%s1319_s3] sm:$0x3] }
  0x15   : > { %419 = vmatpush.bf16.msra.mxu0 %v1026_v4  ;;  %281 = vst.msk [vmem:[#allocation2] sm:$0x3] %vm280_vm2, %v279_v48  ;;  %v562_v49 = vld [vmem:[%s1320_s4] sm:$0xff] }
  0x16   : > { %432 = vmatpush.bf16.msra.mxu1 %v1034_v5  ;;  %v572_v50 = vunpack.c.l.b16 %v562_v49  ;;  %v573_v51 = vunpack.c.h.b16 %v562_v49 }
  0x17   : > { %v1189_v11 = vld.sshfl [vmem:[#allocation1] sm:$0xff pattern:$0x75316420]  ;;  %v1191_v12 = vld.sshfl [vmem:[#allocation1 + $0x8] sm:$0xff pattern:$0x75316420] }
  0x18   : > { %282 = vst [vmem:[#allocation1] ss:$2 sm:$0xff] %v266_v6  ;;  %v574_v54 = vpack.c.b16 %v572_v50, %v572_v50  ;;  %v575_v55 = vpack.c.b16 %v573_v51, %v573_v51 }
  0x19   : > { %420 = vmatpush.bf16.msra.mxu0 %v1025_v7  ;;  %273 = vst [vmem:[%s1247_s15] sm:$0xf] %v1189_v11 }
  0x1a   : > { %433 = vmatpush.bf16.msra.mxu1 %v1033_v8  ;;  %v583_v56 = vand.u32 %v581_v53, %v574_v54  ;;  %v586_v57 = vand.u32 %v581_v53, %v575_v55  ;;  %274 = vst [vmem:[%s1247_s15 + $0x8] sm:$0xf] %v1191_v12  ;;  %v625_v5 = vshrl.u32 %v574_v54, 16  ;;  %v627_v6 = vshll.u32 %v574_v54, 16 }
  0x1b   : > { %v631_v7 = vshrl.u32 %v575_v55, 16  ;;  %v633_v8 = vshll.u32 %v575_v55, 16 }
  0x1c   : > { %v536_v62 = vld [vmem:[#allocation2] sm:$0x3]  ;;  %v629_v11 = vrot.slane %v627_v6, 1 }
  0x1d   : > { %421 = vmatpush.bf16.msra.mxu0 %v1024_v9  ;;  %v563_v9 = vld [vmem:[%s1320_s4 + $0x8] sm:$0xff]  ;;  %v635_v12 = vrot.slane %v633_v8, 1 }
  0x1e   : > { %434 = vmatpush.bf16.msra.mxu1 %v1032_v10  ;;  %v683_v10 = vunpack.c.l.b16 %v563_v9 }
  0x1f   : > { %v283_v19 = vld.sshfl [vmem:[#allocation1] sm:$0xff pattern:$0x75316420]  ;;  %v284_v20 = vld.sshfl [vmem:[#allocation1 + $0x8] sm:$0xff pattern:$0x75316420] }
  0x20   : > { %v287_v21 = vpack.c.bf16 %v283_v19, %v283_v19  ;;  %v288_v22 = vpack.c.bf16 %v284_v20, %v284_v20  ;;  %v1104_v20 = vmov 65535  }
  0x21   : > { %422 = vmatpush.bf16.msra.mxu0 %v1023_v13  ;;  %v684_v13 = vunpack.c.h.b16 %v563_v9 }
  0x22   : > { %435 = vmatpush.bf16.msra.mxu1 %v1031_v14  ;;  %v685_v14 = vpack.c.b16 %v683_v10, %v572_v50 }
  0x24   : > { %v691_v19 = vshll.u32 %v685_v14, 16 }
  0x25   : > { %423 = vmatpush.bf16.msra.mxu0 %v1022_v15  ;;  %v630_v15 = vor.u32 %v629_v11, %v625_v5 }
  0x26   : > { %436 = vmatpush.bf16.msra.mxu1 %v1030_v16  ;;  %v636_v16 = vor.u32 %v635_v12, %v631_v7 }
  0x29   : > { %424 = vmatpush.bf16.msra.mxu0 %v1021_v17  ;;  %v686_v17 = vpack.c.b16 %v684_v13, %v573_v51 }
  0x2a   : > { %437 = vmatpush.bf16.msra.mxu1 %v1029_v18  ;;  %v688_v18 = vshrl.u32 %v685_v14, 16 }
  0x2c   : > { %425 = vmatmul.bf16.vlgmr.msra.gmra.mxu0 %v287_v21  ;;  %v709_v21 = vsel %vm707_vm7, 4294967295, %v1104_v20 }
  0x2d   : > { %438 = vmatmul.bf16.vlgmr.msra.gmra.mxu1 %v288_v22  ;;  %v641_v22 = vsel %vm449_vm0, %v630_v15, 0 }
  0x2e   : > { %653 = vmatpush.bf16.msrb.mxu0 %v641_v22 }
  0xa9   : > { %v426_v23 = vpop.f32.mrf.mxu0 }
  0xaa   : > { %v439_v24 = vpop.f32.mrf.mxu1 }
  0xab   : > { %v440_v25 = vadd.f32 %v439_v24, %v426_v23  ;;  %v644_v23 = vsel %vm449_vm0, %v636_v16, 0  ;;  %v696_v24 = vshrl.u32 %v686_v17, 16 }
  0xac   : > { %666 = vmatpush.bf16.msrb.mxu1 %v644_v23 }
  0xad   : > { %v443_v26 = vpack.c.bf16 %v440_v25, %v440_v25  ;;  %v699_v25 = vshll.u32 %v686_v17, 16 }
  0xaf   : > { %515 = vrot.lane.b32.xlu1 %v443_v26, %s1097_s12  ;;  %469 = vrot.lane.b32.xlu0 %v443_v26, %s1098_s13  ;;  %v451_v27 = vsel %vm449_vm0, %v443_v26, 0 }
  0xb0   : > { %460 = vmatpush.bf16.msra.mxu2 %v451_v27  ;;  %v693_v27 = vrot.slane %v691_v19, 3 }
  0xb1   : > { %v428_v28 = vpop.f32.mrf.mxu0 }
  0xb2   : > { %v441_v29 = vpop.f32.mrf.mxu1  ;;  %v710_v28 = vsel %vm708_vm8, %v709_v21, 0 }
  0xb3   : > { %986 = vmatmul.msk.bf16.vlgmr.msra.gmra.mxu2 %vm445_vm1, %v444_v30  ;;  %v698_v29 = vrot.slane %v696_v24, 2  ;;  %v701_v30 = vrot.slane %v699_v25, 3 }
  0xb7   : > { %492 = vrot.lane.b32.xlu0 %v443_v26, %s1099_s14  ;;  %v690_v26 = vrot.slane %v688_v18, 2 }
 0x121   : > { %v516_v31 = vpop.permute.xlu1 %515  ;;  %v470_v32 = vpop.permute.xlu0 %469 }
 0x122   : > { %v475_v33 = vsel %vm449_vm0, %v470_v32, 0  ;;  %v521_v34 = vsel %vm449_vm0, %v516_v31, 0  ;;  %v694_v31 = vor.u32 %v693_v27, %v690_v26  ;;  %v702_v32 = vor.u32 %v701_v30, %v698_v29 }
 0x123   : > { %484 = vmatpush.bf16.msra.mxu3 %v475_v33 }
 0x124   : > { %v712_v33 = vand.u32 %v710_v28, %v694_v31 }
 0x126   : > { %988 = vmatmul.msk.bf16.vlgmr.msra.gmra.mxu3 %vm445_vm1, %v987_v35  ;;  %v1009_v35 = vld [vmem:[%s1320_s4 + $0x28] sm:$0xf] }
 0x127   : > { %530 = vmatpush.bf16.msrb.mxu3 %v521_v34  ;;  %v715_v34 = vand.u32 %v710_v28, %v702_v32 }
 0x129   : > { %v493_v36 = vpop.permute.xlu0 %492 }
 0x12a   : > { %v498_v37 = vsel %vm449_vm0, %v493_v36, 0  ;;  %v1040_v36 = vld [vmem:[%s1320_s4 + $0x2c] sm:$0x10] }
 0x12b   : > { %507 = vmatpush.bf16.msrb.mxu2 %v498_v37  ;;  %608 = vmatpush.bf16.msra.mxu3 %v586_v57  ;;  %v564_v37 = vld [vmem:[%s1320_s4 + $0x10] sm:$0xff] }
 0x12e   : > { %990 = vmatmul.msk.bf16.vlgmr.msrb.gmra.mxu2 %vm445_vm1, %v989_v38  ;;  %v1010_v38 = vor.u32 %v1040_v36, %v1009_v35 }
 0x12f   : > { %595 = vmatpush.bf16.msra.mxu2 %v583_v56 }
 0x130   : > { %v775_v48 = vrot.slane %v1010_v38, 3 }
 0x132   : > { %v788_v54 = vsel %vm449_vm0, %v775_v48, 0 }
 0x133   : > { %724 = vmatpush.bf16.msrb.mxu2 %v712_v33  ;;  %798 = vmatpush.bf16.msra.mxu0 %v788_v54 }
 0x136   : > { %992 = vmatmul.msk.bf16.vlgmr.msrb.gmra.mxu3 %vm445_vm1, %v991_v39  ;;  %v462_v40 = vpop.f32.mrf.mxu2  ;;  %v1039_v39 = vld [vmem:[%s1320_s4 + $0x2c] sm:$0xf] }
 0x137   : > { %737 = vmatpush.bf16.msrb.mxu3 %v715_v34 }
 0x13e   : > { %v464_v41 = vpop.f32.mrf.mxu2 }
 0x13f   : > { %v1001_v41 = vld [vmem:[%s1320_s4 + $0x18] sm:$0xf] }
 0x1a9   : > { %v486_v42 = vpop.f32.mrf.mxu3 }
 0x1aa   : > { %538 = vrot.lane.b32.xlu1 %v486_v42, %s1100_s27  ;;  %v752_v42 = vunpack.c.l.b16 %v564_v37 }
 0x1ac   : > { %v762_v51 = vpack.c.b16 %v752_v42, %v683_v10 }
 0x1b1   : > { %v488_v43 = vpop.f32.mrf.mxu3  ;;  %v509_v44 = vpop.f32.mrf.mxu2 }
 0x1b2   : > { %542 = vrot.lane.b32.xlu2 %v509_v44, %s1101_s28  ;;  %v753_v43 = vunpack.c.h.b16 %v564_v37 }
 0x1b4   : > { %v763_v53 = vpack.c.b16 %v753_v43, %v684_v13 }
 0x1b9   : > { %v511_v45 = vpop.f32.mrf.mxu2  ;;  %v532_v46 = vpop.f32.mrf.mxu3 }
 0x1ba   : > { %546 = vrot.lane.b32.xlu2 %v532_v46, %s1102_s29  ;;  %v1038_v45 = vld [vmem:[%s1320_s4 + $0x1c] sm:$0xf0]  ;;  %v1037_v46 = vld [vmem:[%s1320_s4 + $0x1c] sm:$0xf] }
 0x1bb   : > { %v1002_v49 = vor.u32 %v1038_v45, %v1001_v41 }
 0x1bd   : > { %v770_v55 = vrot.slane %v1002_v49, 3 }
 0x1c1   : > { %v534_v47 = vpop.f32.mrf.mxu3 }
 0x1c2   : > { %v1003_v47 = vld [vmem:[%s1320_s4 + $0x20] sm:$0xf0] }
 0x1c3   : > { %v1006_v50 = vor.u32 %v1037_v46, %v1003_v47 }
 0x1c5   : > { %v773_v56 = vrot.slane %v1006_v50, 3 }
 0x20c   : > { %v543_v58 = vpop.permute.xlu2 %542 }
 0x214   : > { %v547_v60 = vpop.permute.xlu2 %546 }
 0x21c   : > { %v539_v59 = vpop.permute.xlu1 %538 }
 0x21d   : > { %v550_v61 = vsel %vm549_vm4, %v462_v40, %v539_v59  ;;  %v1011_v40 = vld [vmem:[%s1320_s4 + $0x30] sm:$0x10]  ;;  %v769_v59 = vrot.slane %v762_v51, 3 }
 0x21e   : > { %v552_v63 = vsel %vm551_vm5, %v550_v61, %v543_v58  ;;  %v1014_v44 = vor.u32 %v1039_v39, %v1011_v40  ;;  %v776_v58 = vsel %vm708_vm8, %v770_v55, %v775_v48  ;;  %v772_v61 = vrot.slane %v763_v53, 3 }
 0x21f   : > { %v554_v0 = vsel %vm553_vm6, %v552_v63, %v547_v60  ;;  %799 = vmatpush.bf16.msra.mxu0 %v776_v58 }
 0x220   : > { %v555_v1 = vadd.f32 %v554_v0, %v536_v62  ;;  %v777_v52 = vrot.slane %v1014_v44, 3  ;;  %v771_v62 = vsel %vm708_vm8, %v769_v59, %v770_v55  ;;  %v774_v63 = vsel %vm708_vm8, %v772_v61, %v773_v56 }
 0x222   : > { %557 = vst.msk [vmem:[#allocation2] sm:$0x3] %vm280_vm2, %v555_v1  ;;  %v791_v57 = vsel %vm449_vm0, %v777_v52, 0  ;;  %v778_v60 = vsel %vm708_vm8, %v773_v56, %v777_v52 }
 0x223   : > { %811 = vmatpush.bf16.msra.mxu1 %v791_v57  ;;  %800 = vmatpush.bf16.msra.mxu0 %v771_v62 }
 0x227   : > { %812 = vmatpush.bf16.msra.mxu1 %v778_v60 }
 0x229   : > { %v561_v2 = vld [vmem:[#allocation2] sm:$0x3] }
 0x22a   : > { %v569_v3 = vmax.f32 %v561_v2, 0.0 }
 0x22b   : > { %813 = vmatpush.bf16.msra.mxu1 %v774_v63 }
 0x22c   : > { %v570_v4 = vpack.c.bf16 %v569_v3, %v569_v3 }
 0x22e   : > { %745 = vrot.lane.b32.xlu2 %v570_v4, %s1097_s12  ;;  %680 = vrot.lane.b32.xlu1 %v570_v4, %s1099_s14 }
 0x22f   : > { %623 = vrot.lane.b32.xlu0 %v570_v4, %s1098_s13  ;;  %993 = vmatmul.msk.bf16.vlgmr.msra.gmra.mxu2 %vm549_vm4, %v570_v4 }
 0x230   : > { %994 = vmatmul.msk.bf16.vlgmr.msra.gmra.mxu3 %vm549_vm4, %v570_v4 }
 0x288   : > { %v746_v2 = vpop.permute.xlu2 %745 }
 0x2a0   : > { %v681_v0 = vpop.permute.xlu1 %680 }
 0x2a1   : > { %v624_v1 = vpop.permute.xlu0 %623  ;;  %997 = vmatmul.msk.bf16.vlgmr.msrb.gmra.mxu2 %vm703_vm9, %v681_v0  ;;  %998 = vmatmul.msk.bf16.vlgmr.msrb.gmra.mxu3 %vm703_vm9, %v681_v0 }
 0x2a2   : > { %995 = vmatmul.msk.bf16.vlgmr.msrb.gmra.mxu0 %vm445_vm1, %v624_v1  ;;  %996 = vmatmul.msk.bf16.vlgmr.msrb.gmra.mxu1 %vm445_vm1, %v624_v1 }
 0x2b2   : > { %v597_v3 = vpop.f32.mrf.mxu2  ;;  %1015 = vmatmul.msk.bf16.vlgmr.msra.gmra.mxu0 %vm783_vm10, %v746_v2  ;;  %1016 = vmatmul.msk.bf16.vlgmr.msra.gmra.mxu1 %vm783_vm10, %v746_v2 }
 0x2b3   : > { %v616_v4 = vrot.slane %v597_v3, 4  ;;  %v610_v5 = vpop.f32.mrf.mxu3 }
 0x2b4   : > { %v617_v6 = vrot.slane %v610_v5, 4 }
 0x2b5   : > { %620 = vst [vmem:[%s1247_s15] sm:$0x30] %v616_v4 }
 0x2b6   : > { %621 = vst [vmem:[%s1247_s15 + $0x8] sm:$0x30] %v617_v6 }
 0x2ba   : > { %v599_v7 = vpop.f32.mrf.mxu2 }
 0x2bb   : > { %v612_v8 = vpop.f32.mrf.mxu3 }
 0x31f   : > { %v655_v9 = vpop.f32.mrf.mxu0  ;;  %v668_v10 = vpop.f32.mrf.mxu1 }
 0x320   : > { %v674_v11 = vrot.slane %v655_v9, 2  ;;  %v675_v12 = vrot.slane %v668_v10, 2 }
 0x322   : > { %678 = vst [vmem:[%s1247_s15] sm:$0xc0] %v674_v11 }
 0x323   : > { %679 = vst [vmem:[%s1247_s15 + $0x8] sm:$0xc0] %v675_v12 }
 0x324   : > { %v726_v13 = vpop.f32.mrf.mxu2  ;;  %v739_v14 = vpop.f32.mrf.mxu3 }
 0x325   : > { %743 = vst [vmem:[%s1247_s15 + $0x10] sm:$0x3] %v726_v13 }
 0x326   : > { %744 = vst [vmem:[%s1247_s15 + $0x18] sm:$0x3] %v739_v14 }
 0x327   : > { %v657_v15 = vpop.f32.mrf.mxu0  ;;  %v670_v16 = vpop.f32.mrf.mxu1 }
 0x32c   : > { %v728_v17 = vpop.f32.mrf.mxu2  ;;  %v741_v18 = vpop.f32.mrf.mxu3 }
 0x32f   : > { %v802_v19 = vpop.f32.mrf.mxu0  ;;  %v815_v20 = vpop.f32.mrf.mxu1 }
 0x330   : > { %v821_v21 = vrot.slane %v802_v19, 6  ;;  %v822_v22 = vrot.slane %v815_v20, 6 }
 0x332   : > { %825 = vst [vmem:[%s1247_s15 + $0x10] sm:$0xc] %v821_v21 }
 0x333   : > { %826 = vst [vmem:[%s1247_s15 + $0x18] sm:$0xc] %v822_v22 }
 0x337   : > { %v804_v23 = vpop.f32.mrf.mxu0  ;;  %v817_v24 = vpop.f32.mrf.mxu1 }
 0x338 PF: > { %s15_s20 = sadd.s32 1, %s1095_s20   ;;  %s1322_s18 = smov %s1091_s19 }
 0x339   : > { %p12_p5 = scmp.ge.s32.totalorder %s15_s20, 4   ;;  %s1323_s19 = smov %s1325_s21 }
 0x33b   :  { %14 = sbr.rel (!%p12_p5) target bundleno = 2 (0x2), region = 84 }

</bundles_post_ra>
